<compile_context>
chip_gen: v5e
topology: v5e:2x2
jax: 0.10.0
libtpu: 0.0.40
codegen_flags: <defaults>
</compile_context>

<pallas_src>
import jax
import jax.numpy as jnp
from jax.experimental import pallas as pl
from jax.experimental.pallas import tpu as pltpu


def _round_up(x, m):
    return ((x + m - 1) // m) * m


# ----------------------------------------------------------------------------
# Pallas kernels
# ----------------------------------------------------------------------------
def _matmul_bias_kernel(x_ref, w_ref, b_ref, o_ref):
    """Single full-K contraction: no scratch accumulator, no RMW traffic."""
    o_ref[...] = (
        jnp.dot(x_ref[...], w_ref[...], preferred_element_type=jnp.float32)
        + b_ref[...]
    ).astype(o_ref.dtype)


def _matmul_bias_acc_kernel(x_ref, w_ref, b_ref, o_ref, acc_ref):
    """Fallback for very large K (> _K_TILE_CAP): K-tiled with f32 accumulator."""
    @pl.when(pl.program_id(2) == 0)
    def _():
        acc_ref[...] = jnp.zeros_like(acc_ref)

    acc_ref[...] += jnp.dot(
        x_ref[...], w_ref[...], preferred_element_type=jnp.float32
    )

    @pl.when(pl.program_id(2) == pl.num_programs(2) - 1)
    def _():
        o_ref[...] = (acc_ref[...] + b_ref[...]).astype(o_ref.dtype)


# ----------------------------------------------------------------------------
# Tile planning
# ----------------------------------------------------------------------------
_K_TILE_CAP = 2048   # full-K single tile whenever K <= this (typical PatchEmbed K)
_N_TILE_CAP = 512    # lane-axis (output) tile cap, multiple of 128
_M_TILE_CAP = 512    # row-axis tile cap, multiple of 128; VMEM-safe on v5e/v6e/v7x


def _plan_reduce_dim(k, cap=_K_TILE_CAP):
    """(tk, k_pad) for the contraction dim: full extent when it fits VMEM."""
    if k <= cap:
        return k, k                       # reduction grid collapses to 1
    return cap, _round_up(k, cap)


def _plan_lane_dim(n, cap=_N_TILE_CAP):
    """(tn, n_pad) for the output lane dim: pad to a multiple of 128 so stores
    are lane-dense unmasked vst and the 128/256-wide MXU columns stay fed."""
    if n <= cap:
        t = _round_up(max(n, 1), 128)
        return t, t
    return cap, _round_up(n, cap)


def _plan_row_dim(m, n_tiles, cap=_M_TILE_CAP, align=128):
    """(tm, m_pad) for the row (sublane/MXU-row) dim.

    Prefers 128-multiple tiles that divide M exactly (no tail-pad memory pass).
    Only splits an M that already fits one tile when the (M, N) grid would
    otherwise be (1, 1), so v7x's two TensorCores each get a block; the split
    never produces tm < 128 and never introduces a pad (costs one ~0.35us extra
    grid step on single-TC v5e/v6e, which is negligible)."""
    def _best_divisor(limit):
        best = 0
        t = align
        while t <= min(limit, cap):
            if m % t == 0:
                best = t
            t += align
        return best

    if m > cap:
        best = _best_divisor(cap)
        if best:
            return best, m                # exact divisor -> no tail pad
        return cap, _round_up(m, cap)

    # m fits in a single tile
    if n_tiles == 1 and m >= 2 * align:
        best = _best_divisor(m // 2)
        if best:
            return best, m
    return m, m                           # single full-extent tile (layout-legal)


# ----------------------------------------------------------------------------
# GEMM + bias wrapper
# ----------------------------------------------------------------------------
def pallas_matmul_bias(x, w_padded, b_padded, *, tk, tn, out_dtype=jnp.float32):
    """y = x @ w + b on the MXU.

    `x` is (M, K) bf16; `w_padded` is (k_pad, n_pad) bf16 and `b_padded` is
    (1, n_pad) f32, both zero-padded/cast once at init.  Returns (M, n_pad);
    the caller slices off the N padding."""
    m, k = x.shape
    k_pad, n_pad = w_padded.shape
    grid_k = k_pad // tk
    grid_n = n_pad // tn

    if k_pad != k:                        # only hit when K > _K_TILE_CAP
        x = jnp.pad(x, ((0, 0), (0, k_pad - k)))
    tm, m_pad = _plan_row_dim(m, grid_n)
    if m_pad != m:
        x = jnp.pad(x, ((0, m_pad - m), (0, 0)))
    grid_m = m_pad // tm

    if grid_k == 1:
        out = pl.pallas_call(
            _matmul_bias_kernel,
            out_shape=jax.ShapeDtypeStruct((m_pad, n_pad), out_dtype),
            grid=(grid_m, grid_n),
            in_specs=[
                pl.BlockSpec((tm, tk), lambda i, j: (i, 0)),
                pl.BlockSpec((tk, tn), lambda i, j: (0, j)),
                pl.BlockSpec((1, tn), lambda i, j: (0, j)),
            ],
            out_specs=pl.BlockSpec((tm, tn), lambda i, j: (i, j)),
            compiler_params=pltpu.CompilerParams(
                dimension_semantics=("parallel", "parallel"),
                vmem_limit_bytes=48 * 1024 * 1024,
            ),
        )(x, w_padded, b_padded)
    else:
        out = pl.pallas_call(
            _matmul_bias_acc_kernel,
            out_shape=jax.ShapeDtypeStruct((m_pad, n_pad), out_dtype),
            grid=(grid_m, grid_n, grid_k),
            in_specs=[
                pl.BlockSpec((tm, tk), lambda i, j, kk: (i, kk)),
                pl.BlockSpec((tk, tn), lambda i, j, kk: (kk, j)),
                pl.BlockSpec((1, tn), lambda i, j, kk: (0, j)),
            ],
            out_specs=pl.BlockSpec((tm, tn), lambda i, j, kk: (i, j)),
            scratch_shapes=[pltpu.VMEM((tm, tn), jnp.float32)],
            compiler_params=pltpu.CompilerParams(
                dimension_semantics=("parallel", "parallel", "arbitrary"),
                vmem_limit_bytes=48 * 1024 * 1024,
            ),
        )(x, w_padded, b_padded)

    return out[:m]


# ----------------------------------------------------------------------------
# PatchEmbed3D
# ----------------------------------------------------------------------------
class PatchEmbed3DPallas:
    """Equivalent of the PyTorch PatchEmbed3D forward pass.

    Input:  (B, D, H, W, C) channels-last (matches x.permute(0,4,1,2,3) + Conv3d)
    Output: (B, num_patches, embed_dim)   (matches .flatten(2).transpose(1,2))
    """

    def __init__(self, key, input_shape, patch_size, in_channels, embed_dim,
                 out_dtype=jnp.float32):
        self.input_shape = tuple(input_shape)
        self.patch_size = tuple(patch_size)
        self.in_channels = in_channels
        self.embed_dim = embed_dim
        self.out_dtype = out_dtype
        self.grid_size = tuple(s // p for s, p in zip(input_shape, patch_size))
        self.num_patches = self.grid_size[0] * self.grid_size[1] * self.grid_size[2]

        p0, p1, p2 = self.patch_size
        fan_in = in_channels * p0 * p1 * p2
        self.fan_in = fan_in

        kw, kb = jax.random.split(key)
        bound = 1.0 / (fan_in ** 0.5)
        # Conv3d weight in torch layout (E, Cin, p0, p1, p2), plus bias (E,)
        self.proj_w = jax.random.uniform(
            kw, (embed_dim, in_channels, p0, p1, p2), jnp.float32, -bound, bound)
        self.proj_b = jax.random.uniform(
            kb, (embed_dim,), jnp.float32, -bound, bound)

        # Fold the conv weight into 2-D GEMM form with columns ordered
        # (kd, kh, kw, c) to match channels-last patch extraction; pad + cast
        # to bf16 ONCE here (removes a per-call pad/cast pass from the graph).
        w2d = jnp.transpose(self.proj_w, (2, 3, 4, 1, 0)).reshape(fan_in, embed_dim)
        self._w2d_f32 = w2d                      # reference path only

        self.tk, k_pad = _plan_reduce_dim(fan_in)
        self.tn, n_pad = _plan_lane_dim(embed_dim)
        self.w2d = jnp.pad(
            w2d, ((0, k_pad - fan_in), (0, n_pad - embed_dim))).astype(jnp.bfloat16)
        self.b2d = jnp.pad(
            self.proj_b, (0, n_pad - embed_dim)).reshape(1, n_pad).astype(jnp.float32)

    # --- layout glue: extract non-overlapping patches from channels-last input ---
    def _extract_patches(self, x):
        B = x.shape[0]
        p0, p1, p2 = self.patch_size
        g0, g1, g2 = self.grid_size
        C = self.in_channels
        xr = x.reshape(B, g0, p0, g1, p1, g2, p2, C)
        xr = jnp.transpose(xr, (0, 1, 3, 5, 2, 4, 6, 7))   # (B,g0,g1,g2,p0,p1,p2,C)
        return xr.reshape(B * g0 * g1 * g2, p0 * p1 * p2 * C)

    def __call__(self, x):
        B = x.shape[0]
        # Cast to bf16 BEFORE the layout copy so the transpose materializes half
        # the HBM bytes (the MXU consumes bf16 anyway; accumulation stays f32).
        patches = self._extract_patches(x.astype(jnp.bfloat16))        # (B*P, K)
        # TODO(synk): fold patch extraction into the kernel (BlockSpec over
        # (b, d-row, h-row, W*C) blocks + in-VMEM transpose on the idle XLU) to
        # avoid this HBM round trip entirely on bandwidth-limited v5e.
        y = pallas_matmul_bias(patches, self.w2d, self.b2d,
                               tk=self.tk, tn=self.tn, out_dtype=self.out_dtype)
        y = y[:, :self.embed_dim]                                       # drop N pad
        return y.reshape(B, self.num_patches, self.embed_dim)

    # pure-JAX f32 reference (for correctness checking only)
    def reference(self, x):
        B = x.shape[0]
        patches = self._extract_patches(x.astype(jnp.float32))
        y = patches @ self._w2d_f32 + self.proj_b
        return y.reshape(B, self.num_patches, self.embed_dim)


if __name__ == "__main__":
    key = jax.random.PRNGKey(0)
    k_model, k_x = jax.random.split(key)

    # Small shapes consistent with the module: B=2, spatial 16^3, 2 channels,
    # patch 4^3, embed_dim 64  ->  GEMM (128, 128) @ (128, 64->128 padded).
    model = PatchEmbed3DPallas(
        k_model, input_shape=(16, 16, 16), patch_size=(4, 4, 4),
        in_channels=2, embed_dim=64)
    x = jax.random.normal(k_x, (2, 16, 16, 16, 2), jnp.float32)

    fwd = jax.jit(model.__call__)
    y = jax.block_until_ready(fwd(x))

    assert y.shape == (2, model.num_patches, model.embed_dim), y.shape
    assert bool(jnp.all(jnp.isfinite(y)))

    # Correctness vs. an f32 reference (tolerance covers the bf16 MXU operands).
    y_ref = model.reference(x)
    max_err = float(jnp.max(jnp.abs(y - y_ref)))
    assert max_err < 1e-2, max_err

    print("KERNEL_OK")
</pallas_src>

<mosaic_0001>
module attributes {stable_mosaic.version = 11 : i64} {
  func.func @_matmul_bias_kernel(%arg0: i32, %arg1: i32, %arg2: memref<128x128xbf16, #tpu.memory_space<vmem>>, %arg3: memref<128x128xbf16, #tpu.memory_space<vmem>>, %arg4: memref<1x128xf32, #tpu.memory_space<vmem>>, %arg5: memref<128x128xf32, #tpu.memory_space<vmem>>) attributes {dimension_semantics = [#tpu.dimension_semantics<parallel>, #tpu.dimension_semantics<parallel>], iteration_bounds = array<i64: 1, 1>, scalar_prefetch = 0 : i64, scratch_operands = 0 : i64, tpu.core_type = #tpu.core_type<tc>, window_params = [{transform_indices = @transform_0, window_bounds = array<i64: 128, 128>}, {transform_indices = @transform_1, window_bounds = array<i64: 128, 128>}, {transform_indices = @transform_2, window_bounds = array<i64: 1, 128>}, {transform_indices = @transform_3, window_bounds = array<i64: 128, 128>}]} {
    %c0 = arith.constant 0 : index
    %c0_0 = arith.constant 0 : index
    %0 = vector.load %arg2[%c0, %c0_0] : memref<128x128xbf16, #tpu.memory_space<vmem>>, vector<128x128xbf16>
    %c0_1 = arith.constant 0 : index
    %c0_2 = arith.constant 0 : index
    %1 = vector.load %arg3[%c0_1, %c0_2] : memref<128x128xbf16, #tpu.memory_space<vmem>>, vector<128x128xbf16>
    %cst = arith.constant dense<0.000000e+00> : vector<128x128xf32>
    %2 = tpu.matmul %0, %1, %cst {dimension_numbers = #tpu.dot_dimension_numbers<[1], [0], [0], [1], [0, 0, 1, 1], [], []>} : vector<128x128xbf16>, vector<128x128xbf16>, vector<128x128xf32> -> vector<128x128xf32>
    %c0_3 = arith.constant 0 : index
    %c0_4 = arith.constant 0 : index
    %3 = vector.load %arg4[%c0_3, %c0_4] : memref<1x128xf32, #tpu.memory_space<vmem>>, vector<1x128xf32>
    %4 = vector.broadcast %3 : vector<1x128xf32> to vector<128x128xf32>
    %5 = arith.addf %2, %4 : vector<128x128xf32>
    %c0_5 = arith.constant 0 : index
    %c0_6 = arith.constant 0 : index
    %6 = vector.load %arg5[%c0_5, %c0_6] : memref<128x128xf32, #tpu.memory_space<vmem>>, vector<128x128xf32>
    tpu.vector_store %arg5[%c0_5, %c0_6], %5 {strides = array<i32>} : memref<128x128xf32, #tpu.memory_space<vmem>>, vector<128x128xf32>,
    return
  }
  func.func @transform_0(%arg0: i32, %arg1: i32) -> (i32, i32) {
    %c0_i32 = arith.constant 0 : i32
    %c0_i32_0 = arith.constant 0 : i32
    return %arg0, %c0_i32 : i32, i32
  }
  func.func @transform_1(%arg0: i32, %arg1: i32) -> (i32, i32) {
    %c0_i32 = arith.constant 0 : i32
    %c0_i32_0 = arith.constant 0 : i32
    return %c0_i32, %arg1 : i32, i32
  }
  func.func @transform_2(%arg0: i32, %arg1: i32) -> (i32, i32) {
    %c0_i32 = arith.constant 0 : i32
    %c0_i32_0 = arith.constant 0 : i32
    return %c0_i32, %arg1 : i32, i32
  }
  func.func @transform_3(%arg0: i32, %arg1: i32) -> (i32, i32) {
    %c0_i32 = arith.constant 0 : i32
    return %arg0, %arg1 : i32, i32
  }
}

</mosaic_0001>

<bundles_post_ra>
// kernel: a_call__.1
= control target key start
LH: loop header
LB: loop body
LE: loop exit
PB: predicated region body
PF: predicated region fallthrough
CT: control target
= control target key end

     0   :  { %s441_s0 = inlined_call_operand.vmem [shape: bf16[128,128], index: 0, kind: input, shape index: {}]   ;;  %s442_s1 = inlined_call_operand.vmem [shape: bf16[128,128], index: 1, kind: input, shape index: {}]   ;;  %s443_s2 = inlined_call_operand.vmem [shape: f32[1,128], index: 2, kind: input, shape index: {}]   ;;  %s444_s3 = inlined_call_operand.hbm [shape: f32[128,128], index: 3, kind: output, shape index: {}]  }
   0x1   :  { %v309_v0 = vld [vmem:[%s442_s1 + $0x38] sm:$0xff]  ;;  %v308_v1 = vld [vmem:[%s442_s1 + $0x30] sm:$0xff] }
   0x2   :  { %147 = vmatpush.bf16.msra.mxu0 %v309_v0  ;;  %310 = vmatpush.bf16.msra.mxu1 %v309_v0 }
   0x3   :  { %311 = vmatpush.bf16.msra.mxu2 %v309_v0  ;;  %312 = vmatpush.bf16.msra.mxu3 %v309_v0 }
   0x4   :  { %8 = vsyncpa [#allocation3], 0  ;;  %v307_v2 = vld [vmem:[%s442_s1 + $0x28] sm:$0xff]  ;;  %v306_v3 = vld [vmem:[%s442_s1 + $0x20] sm:$0xff]  ;;  %s218_s20 = sshll.u32 %s444_s3, 4  ;;  %s365_s21 = smov 128   ;;  %s219_s20 = int_to_ptr.hbm [resolvable:$true] %s218_s20 }
   0x5   :  { %v305_v4 = vld [vmem:[%s442_s1 + $0x18] sm:$0xff]  ;;  %v304_v5 = vld [vmem:[%s442_s1 + $0x10] sm:$0xff]  ;;  %v303_v6 = vld [vmem:[%s442_s1 + $0x8] sm:$0xff]  ;;  %s366_s22 = smov 8  }
   0x6   :  { %148 = vmatpush.bf16.msra.mxu0 %v308_v1  ;;  %313 = vmatpush.bf16.msra.mxu1 %v308_v1  ;;  %v302_v7 = vld [vmem:[%s442_s1] sm:$0xff]  ;;  %v296_v9 = vld [vmem:[%s441_s0 + $0x10] sm:$0xff]  ;;  %v295_v12 = vld [vmem:[%s441_s0 + $0x8] sm:$0xff] }
   0x7   :  { %314 = vmatpush.bf16.msra.mxu2 %v308_v1  ;;  %315 = vmatpush.bf16.msra.mxu3 %v308_v1  ;;  %v294_v8 = vld [vmem:[%s441_s0] sm:$0xff]  ;;  %v300_v11 = vld [vmem:[%s441_s0 + $0x30] sm:$0xff]  ;;  %v297_v13 = vld [vmem:[%s441_s0 + $0x18] sm:$0xff] }
   0x8   :  { %v298_v10 = vld [vmem:[%s441_s0 + $0x20] sm:$0xff]  ;;  %v299_v14 = vld [vmem:[%s441_s0 + $0x28] sm:$0xff]  ;;  %v301_v15 = vld [vmem:[%s441_s0 + $0x38] sm:$0xff]  ;;  %s364_s0 = smov [#allocation2]  }
   0x9   :  { %v337_v16 = vld [vmem:[%s443_s2] ss:$0 sm:$0xff]  ;;  %s216_s2 = sshll.u32 %s364_s0, 4  ;;  %s217_s2 = int_to_ptr.vmem [resolvable:$true] %s216_s2 }
   0xa   :  { %149 = vmatpush.bf16.msra.mxu0 %v307_v2  ;;  %316 = vmatpush.bf16.msra.mxu1 %v307_v2 }
   0xb   :  { %317 = vmatpush.bf16.msra.mxu2 %v307_v2  ;;  %318 = vmatpush.bf16.msra.mxu3 %v307_v2 }
   0xe   :  { %150 = vmatpush.bf16.msra.mxu0 %v306_v3  ;;  %319 = vmatpush.bf16.msra.mxu1 %v306_v3 }
   0xf   :  { %320 = vmatpush.bf16.msra.mxu2 %v306_v3  ;;  %321 = vmatpush.bf16.msra.mxu3 %v306_v3 }
  0x12   :  { %151 = vmatpush.bf16.msra.mxu0 %v305_v4  ;;  %322 = vmatpush.bf16.msra.mxu1 %v305_v4 }
  0x13   :  { %323 = vmatpush.bf16.msra.mxu2 %v305_v4  ;;  %324 = vmatpush.bf16.msra.mxu3 %v305_v4 }
  0x16   :  { %152 = vmatpush.bf16.msra.mxu0 %v304_v5  ;;  %325 = vmatpush.bf16.msra.mxu1 %v304_v5 }
  0x17   :  { %326 = vmatpush.bf16.msra.mxu2 %v304_v5  ;;  %327 = vmatpush.bf16.msra.mxu3 %v304_v5 }
  0x1a   :  { %153 = vmatpush.bf16.msra.mxu0 %v303_v6  ;;  %328 = vmatpush.bf16.msra.mxu1 %v303_v6 }
  0x1b   :  { %329 = vmatpush.bf16.msra.mxu2 %v303_v6  ;;  %330 = vmatpush.bf16.msra.mxu3 %v303_v6 }
  0x1e   :  { %154 = vmatpush.bf16.msra.mxu0 %v302_v7  ;;  %331 = vmatpush.bf16.msra.mxu1 %v302_v7 }
  0x1f   :  { %332 = vmatpush.bf16.msra.mxu2 %v302_v7  ;;  %333 = vmatpush.bf16.msra.mxu3 %v302_v7 }
  0x21   :  { %155 = vmatmul.bf16.vlgmr.msra.gmra.mxu0 %v294_v8  ;;  %165 = vmatmul.bf16.vlgmr.msra.gmra.mxu1 %v296_v9 }
  0x22   :  { %175 = vmatmul.bf16.vlgmr.msra.gmra.mxu2 %v298_v10  ;;  %185 = vmatmul.bf16.vlgmr.msra.gmra.mxu3 %v300_v11 }
  0x31   :  { %160 = vmatmul.bf16.gmra.mxu0 %v295_v12  ;;  %170 = vmatmul.bf16.gmra.mxu1 %v297_v13 }
  0x32   :  { %180 = vmatmul.bf16.gmra.mxu2 %v299_v14  ;;  %190 = vmatmul.bf16.gmra.mxu3 %v301_v15 }
  0x9e   :  { %v156_v17 = vpop.f32.mrf.mxu0  ;;  %v166_v18 = vpop.f32.mrf.mxu1 }
  0x9f   :  { %v157_v19 = vadd.f32 %v337_v16, %v156_v17  ;;  %v167_v20 = vadd.f32 %v337_v16, %v166_v18 }
  0xa1   :  { %196 = vst [vmem:[#allocation2] sm:$0xff] %v157_v19 }
  0xa2   :  { %200 = vst [vmem:[#allocation2 + $0x20] sm:$0xff] %v167_v20 }
  0xa5   :  { %v176_v21 = vpop.f32.mrf.mxu2  ;;  %v186_v22 = vpop.f32.mrf.mxu3 }
  0xa6   :  { %v177_v23 = vadd.f32 %v337_v16, %v176_v21  ;;  %v187_v24 = vadd.f32 %v337_v16, %v186_v22  ;;  %v158_v25 = vpop.f32.mrf.mxu0  ;;  %v168_v26 = vpop.f32.mrf.mxu1 }
  0xa7   :  { %v159_v27 = vadd.f32 %v337_v16, %v158_v25  ;;  %v169_v28 = vadd.f32 %v337_v16, %v168_v26 }
  0xa8   :  { %204 = vst [vmem:[#allocation2 + $0x40] sm:$0xff] %v177_v23 }
  0xa9   :  { %208 = vst [vmem:[#allocation2 + $0x60] sm:$0xff] %v187_v24 }
  0xaa   :  { %197 = vst [vmem:[#allocation2 + $0x8] sm:$0xff] %v159_v27 }
  0xab   :  { %201 = vst [vmem:[#allocation2 + $0x28] sm:$0xff] %v169_v28 }
  0xad   :  { %v178_v29 = vpop.f32.mrf.mxu2  ;;  %v188_v30 = vpop.f32.mrf.mxu3 }
  0xae   :  { %v179_v31 = vadd.f32 %v337_v16, %v178_v29  ;;  %v189_v32 = vadd.f32 %v337_v16, %v188_v30  ;;  %v161_v33 = vpop.f32.mrf.mxu0  ;;  %v171_v34 = vpop.f32.mrf.mxu1 }
  0xaf   :  { %v162_v35 = vadd.f32 %v337_v16, %v161_v33  ;;  %v172_v36 = vadd.f32 %v337_v16, %v171_v34 }
  0xb0   :  { %205 = vst [vmem:[#allocation2 + $0x48] sm:$0xff] %v179_v31 }
  0xb1   :  { %209 = vst [vmem:[#allocation2 + $0x68] sm:$0xff] %v189_v32 }
  0xb2   :  { %198 = vst [vmem:[#allocation2 + $0x10] sm:$0xff] %v162_v35 }
  0xb3   :  { %202 = vst [vmem:[#allocation2 + $0x30] sm:$0xff] %v172_v36 }
  0xb5   :  { %v181_v37 = vpop.f32.mrf.mxu2  ;;  %v191_v38 = vpop.f32.mrf.mxu3 }
  0xb6   :  { %v182_v39 = vadd.f32 %v337_v16, %v181_v37  ;;  %v192_v40 = vadd.f32 %v337_v16, %v191_v38  ;;  %v163_v41 = vpop.f32.mrf.mxu0  ;;  %v173_v42 = vpop.f32.mrf.mxu1 }
  0xb7   :  { %v164_v43 = vadd.f32 %v337_v16, %v163_v41  ;;  %v174_v44 = vadd.f32 %v337_v16, %v173_v42 }
  0xb8   :  { %206 = vst [vmem:[#allocation2 + $0x50] sm:$0xff] %v182_v39 }
  0xb9   :  { %210 = vst [vmem:[#allocation2 + $0x70] sm:$0xff] %v192_v40 }
  0xba   :  { %199 = vst [vmem:[#allocation2 + $0x18] sm:$0xff] %v164_v43 }
  0xbb   :  { %203 = vst [vmem:[#allocation2 + $0x38] sm:$0xff] %v174_v44 }
  0xbd   :  { %v183_v45 = vpop.f32.mrf.mxu2  ;;  %v193_v46 = vpop.f32.mrf.mxu3 }
  0xbe   :  { %v184_v47 = vadd.f32 %v337_v16, %v183_v45  ;;  %v194_v48 = vadd.f32 %v337_v16, %v193_v46 }
  0xc0   :  { %207 = vst [vmem:[#allocation2 + $0x58] sm:$0xff] %v184_v47 }
  0xc1   :  { %211 = vst [vmem:[#allocation2 + $0x78] sm:$0xff] %v194_v48 }
  0xc2   :  { %224 = dma.vmem_to_hbm [thread:$0]  %s217_s2, 2048, %s219_s20, [#allocation3], %s365_s21, %s365_s21, %s366_s22  }
  0xc3   :  { %362 = dma.done.wait [#allocation3], 2048  }
  0xc4   :  { %363 = vsyncadd [#allocation3], 4294965248 }
  0xc5   :  { %229 = vsyncpa [#allocation3], 1 }

</bundles_post_ra>
